<compile_context>
chip_gen: v7x
topology: tpu7x:2x2x1
jax: 0.10.0
libtpu: 0.0.40
codegen_flags: <defaults>
</compile_context>

<pallas_src>
import functools
import math

import jax
import jax.numpy as jnp
from jax.experimental import pallas as pl
from jax.experimental.pallas import tpu as pltpu


# ----------------------------------------------------------------------------
# Kernels: softmax over the last (lane) axis, full row in one block.
# ----------------------------------------------------------------------------
def _softmax_rows_kernel(x_ref, o_ref):
    x = x_ref[...].astype(jnp.float32)
    m = jnp.max(x, axis=-1, keepdims=True)
    e = jnp.exp(x - m)
    s = jnp.sum(e, axis=-1, keepdims=True)
    o_ref[...] = (e * pl.reciprocal(s, approx=False)).astype(o_ref.dtype)


def _masked_softmax_rows_kernel(x_ref, mask_ref, o_ref):
    x = x_ref[...].astype(jnp.float32)
    mask = mask_ref[...].astype(jnp.float32)      # (tm, N) or (1, N) broadcast
    m = jnp.max(x, axis=-1, keepdims=True)
    e = jnp.exp(x - m)
    d = e * mask                                  # fused mask + renorm (common
    s = jnp.sum(d, axis=-1, keepdims=True)        # softmax factor cancels)
    o_ref[...] = (d * pl.reciprocal(s, approx=False)).astype(o_ref.dtype)


# ----------------------------------------------------------------------------
# Kernels: softmax over the sublane axis (dim != -1, no wrapper transpose).
# Block shape (1, S, tb); reduce over axis=1.
# ----------------------------------------------------------------------------
def _softmax_sublane_kernel(x_ref, o_ref):
    x = x_ref[...].astype(jnp.float32)
    m = jnp.max(x, axis=1, keepdims=True)
    e = jnp.exp(x - m)
    s = jnp.sum(e, axis=1, keepdims=True)
    o_ref[...] = (e * pl.reciprocal(s, approx=False)).astype(o_ref.dtype)


def _masked_softmax_sublane_kernel(x_ref, mask_ref, o_ref):
    x = x_ref[...].astype(jnp.float32)
    mask = mask_ref[...].astype(jnp.float32)      # (1,S,tb) or (1,S,1)/(1,1,1)
    m = jnp.max(x, axis=1, keepdims=True)
    e = jnp.exp(x - m)
    d = e * mask
    s = jnp.sum(d, axis=1, keepdims=True)
    o_ref[...] = (d * pl.reciprocal(s, approx=False)).astype(o_ref.dtype)


# ----------------------------------------------------------------------------
# Kernels: two-pass N-tiled online softmax (rows too long for a single block).
# Pass 1: running max / rescaled sum over N blocks.  Pass 2: normalize.
# ----------------------------------------------------------------------------
def _stats_rows_kernel(x_ref, m_out, l_out, m_sc, l_sc):
    j = pl.program_id(1)

    @pl.when(j == 0)
    def _():
        m_sc[...] = jnp.full_like(m_sc, -jnp.inf)
        l_sc[...] = jnp.zeros_like(l_sc)

    x = x_ref[...].astype(jnp.float32)
    m_new = jnp.maximum(m_sc[...], jnp.max(x, axis=-1, keepdims=True))
    alpha = jnp.exp(m_sc[...] - m_new)
    l_sc[...] = alpha * l_sc[...] + jnp.sum(jnp.exp(x - m_new), axis=-1,
                                            keepdims=True)
    m_sc[...] = m_new

    @pl.when(j == pl.num_programs(1) - 1)
    def _():
        m_out[...] = m_sc[...]
        l_out[...] = l_sc[...]


def _masked_stats_rows_kernel(x_ref, mask_ref, m_out, l_out, m_sc, l_sc):
    j = pl.program_id(1)

    @pl.when(j == 0)
    def _():
        m_sc[...] = jnp.full_like(m_sc, -jnp.inf)
        l_sc[...] = jnp.zeros_like(l_sc)

    x = x_ref[...].astype(jnp.float32)
    mask = mask_ref[...].astype(jnp.float32)
    m_new = jnp.maximum(m_sc[...], jnp.max(x, axis=-1, keepdims=True))
    alpha = jnp.exp(m_sc[...] - m_new)
    l_sc[...] = alpha * l_sc[...] + jnp.sum(jnp.exp(x - m_new) * mask, axis=-1,
                                            keepdims=True)
    m_sc[...] = m_new

    @pl.when(j == pl.num_programs(1) - 1)
    def _():
        m_out[...] = m_sc[...]
        l_out[...] = l_sc[...]


def _normalize_rows_kernel(x_ref, m_ref, l_ref, o_ref):
    x = x_ref[...].astype(jnp.float32)
    e = jnp.exp(x - m_ref[...])
    o_ref[...] = (e * pl.reciprocal(l_ref[...], approx=False)).astype(o_ref.dtype)


def _masked_normalize_rows_kernel(x_ref, mask_ref, m_ref, l_ref, o_ref):
    x = x_ref[...].astype(jnp.float32)
    mask = mask_ref[...].astype(jnp.float32)
    e = jnp.exp(x - m_ref[...]) * mask
    o_ref[...] = (e * pl.reciprocal(l_ref[...], approx=False)).astype(o_ref.dtype)


# ----------------------------------------------------------------------------
# Tiling helpers (generation-aware).
# ----------------------------------------------------------------------------
def _cdiv(a, b):
    return -(-a // b)


def _round_up(x, m):
    return ((x + m - 1) // m) * m


def _granule(itemsizes):
    g = 8
    for isz in itemsizes:
        if isz == 2:
            g = max(g, 16)
        elif isz == 1:
            g = max(g, 32)
    return g


def _vmem_budget():
    """(slab budget, vmem_limit_bytes) sized to the chip's VMEM capacity."""
    try:
        cap = int(pltpu.get_tpu_info().vmem_capacity_bytes)
    except Exception:
        cap = 128 * 1024 * 1024
    if cap <= 64 * 1024 * 1024:                 # v7x: 64 MiB per TensorCore
        return 14 * 1024 * 1024, 32 * 1024 * 1024
    return 24 * 1024 * 1024, 48 * 1024 * 1024   # v5e / v6e: 128 MiB


def _choose_tm(R, N, itemsizes, budget):
    granule = _granule(itemsizes)
    if R <= granule:
        return R
    # Double-buffered IO slabs + ~3 f32 in-register/VMEM temporaries (x, e, d).
    per_row = 2 * N * sum(itemsizes) + 3 * N * 4
    tm = max(granule, min(1024, (budget // per_row) // granule * granule))
    tm = min(tm, (R // granule) * granule)
    # Guarantee >= 8 grid steps when R allows (pipeline overlap + v7x dual TC),
    # >= 2 otherwise.  Per-step overhead (~0.35 us) is negligible at this size.
    if R >= 2 * granule:
        want = 8 if R >= 8 * granule else 2
        tm = min(tm, max(granule, _round_up(_cdiv(R, want), granule)))
    return int(tm)


def _choose_ntile(R, N, itemsizes, budget):
    """Row/lane tiles for the two-pass N-tiled path (N % 128 == 0)."""
    granule = _granule(itemsizes)
    per_cell = 2 * sum(itemsizes) + 3 * 4
    tn = 128
    t = min(2048, (N // 128) * 128)
    while t >= 128:                              # largest 128-multiple dividing N
        if N % t == 0:
            tn = t
            break
        t -= 128
    if R <= granule:
        tm = R
    else:
        tm = max(granule, min(512, (budget // (per_cell * tn)) // granule * granule))
        tm = min(tm, (R // granule) * granule)
    return int(tm), int(tn)


# ----------------------------------------------------------------------------
# pallas_call builders.
# ----------------------------------------------------------------------------
def _run_rows_ntiled(x2d, mask2d, mask_row_bcast, tm, tn, vmem_limit):
    """Two-pass online softmax over the last axis, tiled over both R and N."""
    R, N = x2d.shape
    rb, nb = _cdiv(R, tm), N // tn

    x_spec = pl.BlockSpec((tm, tn), lambda i, j: (i, j))
    stat_spec = pl.BlockSpec((tm, 1), lambda i, j: (i, 0))
    scratch = [pltpu.VMEM((tm, 1), jnp.float32), pltpu.VMEM((tm, 1), jnp.float32)]
    stats_shape = (jax.ShapeDtypeStruct((R, 1), jnp.float32),
                   jax.ShapeDtypeStruct((R, 1), jnp.float32))
    cp_stats = pltpu.CompilerParams(
        dimension_semantics=("parallel", "arbitrary"), vmem_limit_bytes=vmem_limit)
    cp_norm = pltpu.CompilerParams(
        dimension_semantics=("parallel", "parallel"), vmem_limit_bytes=vmem_limit)

    if mask2d is None:
        m_rows, l_rows = pl.pallas_call(
            _stats_rows_kernel,
            out_shape=stats_shape,
            grid_spec=pltpu.PrefetchScalarGridSpec(
                num_scalar_prefetch=0, grid=(rb, nb),
                in_specs=[x_spec], out_specs=(stat_spec, stat_spec),
                scratch_shapes=scratch),
            compiler_params=cp_stats,
        )(x2d)
        return pl.pallas_call(
            _normalize_rows_kernel,
            out_shape=jax.ShapeDtypeStruct((R, N), x2d.dtype),
            grid_spec=pltpu.PrefetchScalarGridSpec(
                num_scalar_prefetch=0, grid=(rb, nb),
                in_specs=[x_spec, stat_spec, stat_spec], out_specs=x_spec),
            compiler_params=cp_norm,
        )(x2d, m_rows, l_rows)

    if mask_row_bcast:
        if mask2d.shape[1] == 1:
            mspec = pl.BlockSpec((1, 1), lambda i, j: (0, 0))
        else:
            mspec = pl.BlockSpec((1, tn), lambda i, j: (0, j))
    else:
        mspec = pl.BlockSpec((tm, tn), lambda i, j: (i, j))

    m_rows, l_rows = pl.pallas_call(
        _masked_stats_rows_kernel,
        out_shape=stats_shape,
        grid_spec=pltpu.PrefetchScalarGridSpec(
            num_scalar_prefetch=0, grid=(rb, nb),
            in_specs=[x_spec, mspec], out_specs=(stat_spec, stat_spec),
            scratch_shapes=scratch),
        compiler_params=cp_stats,
    )(x2d, mask2d)
    return pl.pallas_call(
        _masked_normalize_rows_kernel,
        out_shape=jax.ShapeDtypeStruct((R, N), x2d.dtype),
        grid_spec=pltpu.PrefetchScalarGridSpec(
            num_scalar_prefetch=0, grid=(rb, nb),
            in_specs=[x_spec, mspec, stat_spec, stat_spec], out_specs=x_spec),
        compiler_params=cp_norm,
    )(x2d, mask2d, m_rows, l_rows)


def _run_rows(x2d, mask2d, mask_row_bcast):
    """Softmax over the last axis of a (R, N) slab."""
    R, N = x2d.shape
    budget, vmem_limit = _vmem_budget()
    itemsizes = [x2d.dtype.itemsize, x2d.dtype.itemsize]      # input + output
    if mask2d is not None and not mask_row_bcast:
        itemsizes.append(mask2d.dtype.itemsize)

    granule = _granule(itemsizes)
    per_row = 2 * N * sum(itemsizes) + 3 * N * 4

    # Long rows: even the minimum row tile blows the VMEM budget -> two-pass
    # N-tiled online softmax (essential on v7x's 64 MiB VMEM).
    if per_row * min(R, granule) > budget and N % 128 == 0 and N > 128:
        tm, tn = _choose_ntile(R, N, itemsizes, budget)
        return _run_rows_ntiled(x2d, mask2d, mask_row_bcast, tm, tn, vmem_limit)
    # TODO(synk): rows that do not fit VMEM and are not a multiple of 128 still
    # take the single-block path below (needs ragged-column masking in-kernel).

    tm = _choose_tm(R, N, itemsizes, budget)
    steps = _cdiv(R, tm)
    cparams = pltpu.CompilerParams(
        dimension_semantics=("parallel",), vmem_limit_bytes=vmem_limit)
    row_spec = pl.BlockSpec((tm, N), lambda i: (i, 0))

    if mask2d is None:
        return pl.pallas_call(
            _softmax_rows_kernel,
            out_shape=jax.ShapeDtypeStruct((R, N), x2d.dtype),
            grid_spec=pltpu.PrefetchScalarGridSpec(
                num_scalar_prefetch=0, grid=(steps,),
                in_specs=[row_spec], out_specs=row_spec),
            compiler_params=cparams,
        )(x2d)

    if mask_row_bcast:
        mspec = pl.BlockSpec((1, mask2d.shape[1]), lambda i: (0, 0))
    else:
        mspec = pl.BlockSpec((tm, N), lambda i: (i, 0))
    return pl.pallas_call(
        _masked_softmax_rows_kernel,
        out_shape=jax.ShapeDtypeStruct((R, N), x2d.dtype),
        grid_spec=pltpu.PrefetchScalarGridSpec(
            num_scalar_prefetch=0, grid=(steps,),
            in_specs=[row_spec, mspec], out_specs=row_spec),
        compiler_params=cparams,
    )(x2d, mask2d)


def _run_sublane(x3, mask3, mask_axis_only):
    """Softmax over the middle axis of a (A, S, B) slab (dim != -1 path)."""
    A, S, B = x3.shape
    budget, vmem_limit = _vmem_budget()
    itemsizes = [x3.dtype.itemsize, x3.dtype.itemsize]
    if mask3 is not None and not mask_axis_only:
        itemsizes.append(mask3.dtype.itemsize)
    per_col = 2 * S * sum(itemsizes) + 3 * S * 4
    # TODO(synk): tile S with an online accumulator when the full softmax axis
    # no longer fits VMEM (very long non-last softmax axes, esp. on v7x).
    if B <= 128:
        tb = B  # TODO(synk): pack several short lane rows per vreg when B < 128.
    else:
        tb = max(128, min(4096, (budget // per_col) // 128 * 128))
        want = max(1, _cdiv(8, A))                 # aim for >= 8 total steps
        tb = min(tb, max(128, _round_up(_cdiv(B, want), 128)))
        if tb >= B:
            tb = B
    grid = (A, _cdiv(B, tb))
    cparams = pltpu.CompilerParams(
        dimension_semantics=("parallel", "parallel"), vmem_limit_bytes=vmem_limit)
    x_spec = pl.BlockSpec((1, S, tb), lambda a, j: (a, 0, j))

    if mask3 is None:
        return pl.pallas_call(
            _softmax_sublane_kernel,
            out_shape=jax.ShapeDtypeStruct((A, S, B), x3.dtype),
            grid_spec=pltpu.PrefetchScalarGridSpec(
                num_scalar_prefetch=0, grid=grid,
                in_specs=[x_spec], out_specs=x_spec),
            compiler_params=cparams,
        )(x3)

    if mask_axis_only:
        mspec = pl.BlockSpec((1, mask3.shape[1], 1), lambda a, j: (0, 0, 0))
    else:
        mspec = pl.BlockSpec((1, S, tb), lambda a, j: (a, 0, j))
    return pl.pallas_call(
        _masked_softmax_sublane_kernel,
        out_shape=jax.ShapeDtypeStruct((A, S, B), x3.dtype),
        grid_spec=pltpu.PrefetchScalarGridSpec(
            num_scalar_prefetch=0, grid=grid,
            in_specs=[x_spec, mspec], out_specs=x_spec),
        compiler_params=cparams,
    )(x3, mask3)


# ----------------------------------------------------------------------------
# Public wrapper.
# ----------------------------------------------------------------------------
def _softmax_last(logit, mask):
    shape = logit.shape
    ndim = len(shape)
    N = shape[-1]
    R = math.prod(shape[:-1])
    x2d = logit.reshape(R, N)

    mask2d, row_bcast = None, False
    if mask is not None:
        padded = (1,) * (ndim - mask.ndim) + tuple(mask.shape)
        if padded == tuple(shape):
            mask2d = mask.reshape(R, N)
        elif all(p == 1 for p in padded[:-1]):
            # Mask varies only along the softmax axis: feed a (1, N) block
            # pinned to block 0 and broadcast in-kernel (no materialization).
            mask2d = mask.reshape(1, padded[-1])
            row_bcast = True
        else:
            # TODO(synk): partially-broadcast masks (e.g. per-head) should use
            # a dedicated index_map instead of being materialized in HBM.
            mask2d = jnp.broadcast_to(mask, shape).reshape(R, N)

    return _run_rows(x2d, mask2d, row_bcast).reshape(shape)


def _softmax_middle(logit, mask, dim):
    shape = logit.shape
    ndim = len(shape)
    A = math.prod(shape[:dim])
    S = shape[dim]
    B = math.prod(shape[dim + 1:])
    x3 = logit.reshape(A, S, B)          # contiguous merge: no HBM transpose

    mask3, axis_only = None, False
    if mask is not None:
        padded = (1,) * (ndim - mask.ndim) + tuple(mask.shape)
        if padded == tuple(shape):
            mask3 = mask.reshape(A, S, B)
        elif all(p == 1 for i, p in enumerate(padded) if i != dim):
            mask3 = mask.reshape(1, padded[dim], 1)
            axis_only = True
        else:
            # TODO(synk): avoid materializing partially-broadcast masks.
            mask3 = jnp.broadcast_to(mask, shape).reshape(A, S, B)

    return _run_sublane(x3, mask3, axis_only).reshape(shape)


@functools.partial(jax.jit, static_argnames=("dim",))
def masked_softmax(logit, mask=None, *, dim=-1):
    """Pallas equivalent of MaskedSoftmax(dim)(logit, mask)."""
    ndim = logit.ndim
    d = dim % ndim
    if mask is not None and jnp.issubdtype(mask.dtype, jnp.bool_):
        # Keep bool masks narrow on the wire (1 B/elem); cast to f32 in-kernel.
        mask = mask.astype(jnp.int8)
    if d == ndim - 1:
        return _softmax_last(logit, mask)
    return _softmax_middle(logit, mask, d)


def _reference(logit, mask=None, dim=-1):
    x = logit - jnp.max(logit, axis=dim, keepdims=True)
    dist = jax.nn.softmax(x, axis=dim)
    if mask is None:
        return dist
    dist_ = dist * mask
    return dist_ / jnp.sum(dist_, axis=dim, keepdims=True)


if __name__ == "__main__":
    key = jax.random.PRNGKey(0)
    k1, k2, k3, k4, k5, k6 = jax.random.split(key, 6)

    # 1) Attention-style logits, softmax over the last axis, no mask.
    logit = jax.random.normal(k1, (2, 4, 16, 128), dtype=jnp.float32)
    out_plain = masked_softmax(logit, None, dim=-1)
    jax.block_until_ready(out_plain)
    assert jnp.allclose(out_plain, _reference(logit, None, -1),
                        atol=1e-5, rtol=1e-5)

    # 2) Full-shape bool mask (stays int8 on the wire, cast to f32 in-kernel).
    mask_b = jax.random.uniform(k2, (2, 4, 16, 128)) > 0.3
    mask_b = mask_b.at[..., 0].set(True)        # avoid all-masked rows (0/0)
    out_masked = masked_softmax(logit, mask_b, dim=-1)
    jax.block_until_ready(out_masked)
    assert jnp.allclose(out_masked,
                        _reference(logit, mask_b.astype(jnp.float32), -1),
                        atol=1e-5, rtol=1e-5)

    # 3) Row-broadcast float mask of shape (N,): not materialized, (1, N) block.
    mask_r = (jax.random.uniform(k3, (128,)) > 0.3).astype(jnp.float32)
    mask_r = mask_r.at[0].set(1.0)
    out_rb = masked_softmax(logit, mask_r, dim=-1)
    jax.block_until_ready(out_rb)
    assert jnp.allclose(out_rb, _reference(logit, mask_r, -1),
                        atol=1e-5, rtol=1e-5)

    # 4) Softmax over a middle axis: no wrapper transpose, sublane reduction.
    logit2 = jax.random.normal(k4, (2, 16, 8, 128), dtype=jnp.float32)
    out_d1 = masked_softmax(logit2, None, dim=1)
    jax.block_until_ready(out_d1)
    assert jnp.allclose(out_d1, _reference(logit2, None, 1),
                        atol=1e-5, rtol=1e-5)

    # 5) Middle-axis softmax with a full-shape bool mask.
    mask2 = jax.random.uniform(k5, (2, 16, 8, 128)) > 0.3
    mask2 = mask2.at[:, 0].set(True)
    out_d1m = masked_softmax(logit2, mask2, dim=1)
    jax.block_until_ready(out_d1m)
    assert jnp.allclose(out_d1m,
                        _reference(logit2, mask2.astype(jnp.float32), 1),
                        atol=1e-5, rtol=1e-5)

    # 6) Exercise the N-tiled two-pass online-softmax path at a small shape.
    x_long = jax.random.normal(k6, (64, 512), dtype=jnp.float32)
    m_long = (jax.random.uniform(k1, (64, 512)) > 0.3).astype(jnp.float32)
    m_long = m_long.at[:, 0].set(1.0)
    _, _vlim = _vmem_budget()
    out_nt = _run_rows_ntiled(x_long, None, False, 32, 128, _vlim)
    jax.block_until_ready(out_nt)
    assert jnp.allclose(out_nt, _reference(x_long, None, -1),
                        atol=1e-5, rtol=1e-5)
    out_ntm = _run_rows_ntiled(x_long, m_long, False, 32, 128, _vlim)
    jax.block_until_ready(out_ntm)
    assert jnp.allclose(out_ntm, _reference(x_long, m_long, -1),
                        atol=1e-5, rtol=1e-5)

    print("KERNEL_OK")
</pallas_src>

<mosaic_0001>
module attributes {stable_mosaic.version = 11 : i64} {
  func.func @_softmax_rows_kernel(%arg0: i32, %arg1: memref<16x128xf32, #tpu.memory_space<vmem>>, %arg2: memref<16x128xf32, #tpu.memory_space<vmem>>) attributes {dimension_semantics = [#tpu.dimension_semantics<parallel>], iteration_bounds = array<i64: 8>, scalar_prefetch = 0 : i64, scratch_operands = 0 : i64, tpu.core_type = #tpu.core_type<tc>, window_params = [{transform_indices = @transform_0, window_bounds = array<i64: 16, 128>}, {transform_indices = @transform_1, window_bounds = array<i64: 16, 128>}]} {
    %c0 = arith.constant 0 : index
    %c0_0 = arith.constant 0 : index
    %0 = vector.load %arg1[%c0, %c0_0] : memref<16x128xf32, #tpu.memory_space<vmem>>, vector<16x128xf32>
    %cst = arith.constant dense<0xFF800000> : vector<16xf32>
    %1 = vector.multi_reduction <maximumf>, %0, %cst [1] : vector<16x128xf32> to vector<16xf32>
    %2 = vector.shape_cast %1 : vector<16xf32> to vector<16x1xf32>
    %3 = vector.broadcast %2 : vector<16x1xf32> to vector<16x128xf32>
    %4 = arith.subf %0, %3 : vector<16x128xf32>
    %5 = math.exp %4 : vector<16x128xf32>
    %cst_1 = arith.constant dense<0.000000e+00> : vector<16xf32>
    %6 = vector.multi_reduction <add>, %5, %cst_1 [1] : vector<16x128xf32> to vector<16xf32>
    %7 = vector.shape_cast %6 : vector<16xf32> to vector<16x1xf32>
    %8 = tpu.reciprocal %7 : vector<16x1xf32> -> vector<16x1xf32>
    %9 = vector.broadcast %8 : vector<16x1xf32> to vector<16x128xf32>
    %10 = arith.mulf %5, %9 : vector<16x128xf32>
    %c0_2 = arith.constant 0 : index
    %c0_3 = arith.constant 0 : index
    %11 = vector.load %arg2[%c0_2, %c0_3] : memref<16x128xf32, #tpu.memory_space<vmem>>, vector<16x128xf32>
    tpu.vector_store %arg2[%c0_2, %c0_3], %10 {strides = array<i32>} : memref<16x128xf32, #tpu.memory_space<vmem>>, vector<16x128xf32>,
    return
  }
  func.func @transform_0(%arg0: i32) -> (i32, i32) {
    %c0_i32 = arith.constant 0 : i32
    %c0_i32_0 = arith.constant 0 : i32
    return %arg0, %c0_i32 : i32, i32
  }
  func.func @transform_1(%arg0: i32) -> (i32, i32) {
    %c0_i32 = arith.constant 0 : i32
    %c0_i32_0 = arith.constant 0 : i32
    return %arg0, %c0_i32 : i32, i32
  }
}

</mosaic_0001>

<bundles_post_ra>
// kernel: masked_softmax.1
= control target key start
LH: loop header
LB: loop body
LE: loop exit
PB: predicated region body
PF: predicated region fallthrough
CT: control target
= control target key end

     0   :  { %6 = vsyncpa [#allocation3], 0  ;;  %s594_s0 = inlined_call_operand.hbm [shape: f32[128,128], index: 0, kind: input, shape index: {}]   ;;  %s595_s1 = inlined_call_operand.hbm [shape: f32[128,128], index: 1, kind: output, shape index: {}]  }
   0x1   :  { %8 = vsyncpa [#allocation3 + $0x1], 0 }
   0x2   :  { %9 = vsyncpa [#allocation4], 0 }
   0x3   :  { %11 = vsyncpa [#allocation4 + $0x1], 0  ;;  %s434_s6 = smov 0   ;;  %s436_s7 = smov 0  }
   0x4   :  { %s438_s8 = smov 0   ;;  %s440_s9 = smov 0  }
   0x5 LB: > { %s455_s10 = sadd.s32 4294967295, %s416_s9   ;;  %s246_s11 = sadd.s32 4294967294, %s416_s9   ;;  %s416_s9 = sphi %s440_s9, %s607_s9   ;;  %s412_s8 = sphi %s438_s8, %s606_s8   ;;  %s408_s7 = sphi %s436_s7, %s605_s7   ;;  %s404_s6 = sphi %s434_s6, %s604_s6  }
   0x6   : > { %s459_s12 = sadd.s32 1, %s416_s9   ;;  %s24_s13 = sadd.s32 1, %s412_s8 }
   0x7   : > { %s21_s14 = ssub.s32 %s416_s9, %s459_s12  ;;  %p31_p0 = scmp.ne.s32.totalorder %s412_s8, %s408_s7 }
   0x8   : > { %p22_p1 = scmp.eq.s32.totalorder %s21_s14, 0  ;;  %p32_p2 = scmp.eq.s32.totalorder %s416_s9, 0 }
   0x9   : > { %p37_p3 = scmp.ne.s32.totalorder %s408_s7, %s404_s6  ;;  %p38_p4 = scmp.eq.s32.totalorder %s455_s10, 0 }
   0xa   : > { %s471_s15 = scalar_select %p22_p1, %s412_s8, %s24_s13  }
   0xb   : > { %p473_p5 = por %p32_p2, %p31_p0  ;;  %p477_p6 = por %p38_p4, %p37_p3 }
   0xc   : > { %p61_p7 = scmp.eq.s32.totalorder %s455_s10, 7  ;;  %p67_p8 = scmp.eq.s32.totalorder %s246_s11, 7 }
   0xd   : > { %p274_p9 = scmp.lt.s32.totalorder %s416_s9, 8  ;;  %s87_s20 = sand.u32 1, %s412_s8  }
   0xe   : > { %p483_p10 = por %p61_p7, %p31_p0  ;;  %p487_p11 = por %p67_p8, %p37_p3 }
   0xf   : > { %s260_s21 = sshll.u32 %s416_s9, 8  ;;  %s249_s22 = sshll.u32 %s87_s20, 4 }
  0x10   : > { %s599_s18 = scalar_select %p483_p10, 1, 0 }
  0x11   : > { %s600_s19 = scalar_select %p487_p11, 1, 0 }
  0x12   : > { %s496_s25 = scalar_lea.hbm %s594_s0, %s260_s21  ;;  %s91_s26 = scalar_lea.vmem [#allocation2], %s249_s22 }
  0x13   : > { %s98_s27 = sshll.u32 %s91_s26, 4  ;;  %p500_p12 = pnand %p274_p9, %p473_p5  ;;  %s504_s27 = int_to_ptr.vmem [resolvable:$true] %s98_s27 }
  0x14   : > { %s506_s29 = scalar_lea.sflag [#allocation3], %s87_s20  ;;  %s320_s30 = scalar_lea.hbm %s496_s25, 256 }
  0x15   : > { %p321_p13 = scmp.ne.s32.totalorder %s496_s25, %s320_s30  ;;  %p322_p0 = pneg %p500_p12 }
  0x16   : > { %s325_s4 = scalar_lea.hbm %s594_s0, 2048  ;;  %p326_p3 = scmp.lt.u32.totalorder %s496_s25, %s594_s0 }
  0x17   : > { %p323_p1 = pnand %p322_p0, %p321_p13  ;;  %p327_p4 = scmp.lt.u32.totalorder %s325_s4, %s320_s30 }
  0x18   : > { %p329_p7 = scmp.lt.u32.totalorder %s320_s30, %s496_s25 }
  0x19   : > { %p324_p2 = pneg %p323_p1  ;;  %p328_p5 = por %p327_p4, %p326_p3 }
  0x1b   : > { %p330_p8 = por %p329_p7, %p328_p5 }
  0x1d   : > { %p331_p9 = pnand %p330_p8, %p324_p2 }
  0x1f   : > { %334 = shalt.err (!%p331_p9)
}
  0x20   : > { %s335_s13 = scalar_lea.vmem %s504_s27, 256  ;;  %s418_s14 = smov [#allocation2]  }
  0x21   : > { %p336_p13 = scmp.ne.s32.totalorder %s504_s27, %s335_s13  ;;  %s340_s16 = sshll.u32 %s418_s14, 4  ;;  %s341_s16 = int_to_ptr.vmem [resolvable:$false] %s340_s16 }
  0x22   : > { %s342_s20 = scalar_lea.vmem %s341_s16, 512  ;;  %p343_p10 = scmp.lt.s32.totalorder %s504_s27, %s341_s16 }
  0x23   : > { %p338_p1 = pnand %p336_p13, %p322_p0  ;;  %p344_p3 = scmp.lt.s32.totalorder %s342_s20, %s335_s13 }
  0x25   : > { %p339_p11 = pneg %p338_p1  ;;  %p345_p4 = por %p344_p3, %p343_p10 }
  0x27   : > { %p346_p5 = pnand %p345_p4, %p339_p11 }
  0x29   : > { %349 = shalt.err (!%p346_p5)
}
  0x2a   : > { %s419_s21 = smov 128   ;;  %s420_s22 = smov 8  }
  0x2b   : > { %269 = dma.hbm_to_vmem [thread:$0]  (!%p500_p12), %s496_s25, 256, %s504_s27, %s506_s29, %s419_s21, %s419_s21, %s420_s22  }
  0x2c   : > { %p252_p0 = scmp.ge.s32.totalorder %s416_s9, 1  ;;  %p106_p2 = scmp.lt.s32.totalorder %s416_s9, 9 }
  0x2e   : > { %p107_p7 = pnand %p252_p0, %p106_p2 }
  0x2f   : > { %s537_s23 = sand.u32 (!%p107_p7), 1, %s408_s7  }
  0x30   : > { %110 = sbr.rel (%p107_p7) target bundleno = 388 (0x184), region = 24  ;;  %s253_s24 = sshll.u32 (!%p107_p7), %s537_s23, 4 }
  0x31   : > { %s113_s26 = scalar_lea.sflag (!%p107_p7), [#allocation3], %s537_s23  ;;  %s116_s30 = scalar_lea.vmem (!%p107_p7), [#allocation2], %s253_s24 }
  0x37   : > { %395 = dma.done.wait (%p477_p6), %s113_s26, 256  }
  0x38   : > { %397 = vsyncadd (%p477_p6), %s113_s26, 4294967040  ;;  %v137_v0 = vld [vmem:[%s116_s30] sm:$0xff]  ;;  %v138_v1 = vld [vmem:[%s116_s30 + $0x8] sm:$0xff]  ;;  %s261_s17 = sshll.u32 %s455_s10, 8  ;;  %s134_s25 = scalar_lea.vmem [#allocation5], %s253_s24 }
  0x39   : > { %139 = vmax.xlane.f32.xlu0 %v137_v0  ;;  %s173_s27 = sshll.u32 %s134_s25, 4  ;;  %s549_s2 = scalar_lea.hbm %s595_s1, %s261_s17  ;;  %s551_s27 = int_to_ptr.vmem [resolvable:$true] %s173_s27 }
  0x3a   : > { %s160_s3 = scalar_lea.sflag [#allocation4], %s537_s23  ;;  %s350_s4 = scalar_lea.vmem %s551_s27, 256 }
  0x3b   : > { %p351_p6 = scmp.ne.s32.totalorder %s551_s27, %s350_s4  ;;  %p602_p10 = scmp.ne.s32.totalorder %s599_s18, 0 }
  0x3c   : > { %s421_s10 = smov [#allocation5]  }
  0x3d   : > { %141 = vmax.xlane.f32.xlu0 %v138_v1  ;;  %p352_p11 = pnand %p351_p6, %p602_p10  ;;  %s354_s5 = sshll.u32 %s421_s10, 4  ;;  %s355_s5 = int_to_ptr.vmem [resolvable:$false] %s354_s5 }
  0x3e   : > { %s356_s11 = scalar_lea.vmem %s355_s5, 512  ;;  %p357_p8 = scmp.lt.s32.totalorder %s551_s27, %s355_s5 }
  0x3f   : > { %p353_p12 = pneg %p352_p11  ;;  %p358_p9 = scmp.lt.s32.totalorder %s356_s11, %s350_s4 }
  0x41   : > { %p359_p13 = por %p358_p9, %p357_p8 }
  0x43   : > { %p360_p1 = pnand %p359_p13, %p353_p12 }
  0xc6   : > { %v140_v2 = vpop.xlane.xlu0 %139 }
  0xc7   : > { %v143_v3 = vsub.f32 %v137_v0, %v140_v2 }
  0xc9   : > { %v145_v4 = vmul.f32 1.442695, %v143_v3 }
  0xca   : > { %v142_v5 = vpop.xlane.xlu0 %141 }
  0xcb   : > { %312 = vpow2.f32 %v145_v4  ;;  %v144_v6 = vsub.f32 %v138_v1, %v142_v5 }
  0xcd   : > { %v147_v7 = vmul.f32 1.442695, %v144_v6 }
  0xcf   : > { %314 = vpow2.f32 %v147_v7 }
  0xd5   : > { %v313_v8 = vpop.eup %312 }
  0xd6   : > { %149 = vadd.xlane.f32.xlu1 %v313_v8 }
  0xd9   : > { %v315_v9 = vpop.eup %314 }
  0xda   : > { %151 = vadd.xlane.f32.xlu1 %v315_v9 }
 0x163   : > { %v150_v10 = vpop.xlane.xlu1 %149 }
 0x164   : > { %316 = vrcp.f32 %v150_v10 }
 0x167   : > { %v152_v11 = vpop.xlane.xlu1 %151 }
 0x168   : > { %318 = vrcp.f32 %v152_v11 }
 0x16e   : > { %v317_v12 = vpop.eup %316 }
 0x16f   : > { %v155_v13 = vmul.f32 %v317_v12, %v313_v8 }
 0x171   : > { %157 = vst [vmem:[%s134_s25] sm:$0xff] %v155_v13 }
 0x172   : > { %v319_v14 = vpop.eup %318 }
 0x173   : > { %v156_v15 = vmul.f32 %v319_v14, %v315_v9 }
 0x175   : > { %158 = vst [vmem:[%s134_s25 + $0x8] sm:$0xff] %v156_v15 }
 0x176   : > { %363 = shalt.err (!%p360_p1)
}
 0x177   : > { %s364_s13 = scalar_lea.hbm %s549_s2, 256  ;;  %s368_s20 = scalar_lea.hbm %s595_s1, 2048 }
 0x178   : > { %p365_p3 = scmp.ne.s32.totalorder %s549_s2, %s364_s13  ;;  %p369_p0 = scmp.lt.u32.totalorder %s549_s2, %s595_s1 }
 0x179   : > { %p370_p2 = scmp.lt.u32.totalorder %s368_s20, %s364_s13  ;;  %p372_p6 = scmp.lt.u32.totalorder %s364_s13, %s549_s2 }
 0x17a   : > { %p366_p4 = pnand %p365_p3, %p602_p10 }
 0x17b   : > { %p371_p7 = por %p370_p2, %p369_p0 }
 0x17c   : > { %p367_p5 = pneg %p366_p4 }
 0x17d   : > { %p373_p11 = por %p372_p6, %p371_p7 }
 0x17f   : > { %p374_p12 = pnand %p373_p11, %p367_p5 }
 0x181   : > { %377 = shalt.err (!%p374_p12)
}
 0x182   : > { %s422_s24 = smov 128   ;;  %s423_s26 = smov 8  }
 0x183   : > { %264 = dma.vmem_to_hbm [thread:$0]  (%p602_p10), %s551_s27, 256, %s549_s2, %s160_s3, %s422_s24, %s422_s24, %s423_s26  }
 0x184 PF: > { %p275_p8 = scmp.ge.s32.totalorder %s416_s9, 2  ;;  %s188_s30 = sand.u32 1, %s404_s6  }
 0x185   : > { %p603_p9 = scmp.ne.s32.totalorder %s600_s19, 0  ;;  %s189_s17 = scalar_lea.sflag [#allocation4], %s188_s30 }
 0x187   : > { %p271_p13 = pnand %p275_p8, %p603_p9 }
 0x189   : > { %399 = dma.done.wait (!%p271_p13), %s189_s17, 256  }
 0x18a   : > { %401 = vsyncadd (!%p271_p13), %s189_s17, 4294967040  ;;  %p14_p1 = scmp.ge.s32.totalorder %s459_s12, 10   ;;  %s604_s6 = smov %s408_s7 }
 0x18b   : > { %s605_s7 = smov %s412_s8  ;;  %s606_s8 = smov %s471_s15 }
 0x18c   : > { %s607_s9 = smov %s459_s12  ;;  %16 = sbr.rel (!%p14_p1) target bundleno = 5 (0x5), region = 69 }
 0x193   :  { %194 = vsyncpa [#allocation3], 1 }
 0x194   :  { %196 = vsyncpa [#allocation3 + $0x1], 1 }
 0x195   :  { %197 = vsyncpa [#allocation4], 1 }
 0x196   :  { %199 = vsyncpa [#allocation4 + $0x1], 1 }

</bundles_post_ra>
